<compile_context>
chip_gen: v6e
topology: v6e:2x2x1
jax: 0.10.0
libtpu: 0.0.40
codegen_flags: <defaults>
</compile_context>

<pallas_src>
import jax
import jax.numpy as jnp
from jax.experimental import pallas as pl
from jax.experimental.pallas import tpu as pltpu

_LANES = 128          # vreg lane width (fast axis)
_SUBLANES = 8         # vreg sublane width (slow axis)
_MAX_TILE_ROWS = 2048  # (2048, 128) f32 = 1 MiB per buffer; safe on v5e/v6e/v7x


def _scale_kernel(x_ref, o_ref):
    # Elementwise hot path: one VPU multiply per vreg. `100` is weak-typed so
    # the result stays in the input dtype, matching the PyTorch reference.
    o_ref[...] = x_ref[...] * 100


def _round_up(a: int, b: int) -> int:
    return ((a + b - 1) // b) * b


def dummy_module_forward(x: jax.Array) -> jax.Array:
    """Pallas equivalent of DummyModule.forward: identity(x) * 100."""
    orig_shape, orig_dtype = x.shape, x.dtype
    total = x.size

    # ---- lane-dense 2D view ------------------------------------------------
    rows = pl.cdiv(total, _LANES)
    # Tile rows: full-VMEM-friendly cap, multiple of the 8-sublane granule.
    tile_rows = min(_MAX_TILE_ROWS, _round_up(rows, _SUBLANES))
    padded_rows = _round_up(rows, tile_rows)
    padded_total = padded_rows * _LANES

    flat = x.reshape(-1)
    if padded_total != total:
        flat = jnp.pad(flat, (0, padded_total - total))
    x2d = flat.reshape(padded_rows, _LANES)

    # ---- tiled, double-buffered pallas_call --------------------------------
    grid = (padded_rows // tile_rows,)
    y2d = pl.pallas_call(
        _scale_kernel,
        out_shape=jax.ShapeDtypeStruct((padded_rows, _LANES), orig_dtype),
        grid=grid,
        in_specs=[pl.BlockSpec((tile_rows, _LANES), lambda i: (i, 0))],
        out_specs=pl.BlockSpec((tile_rows, _LANES), lambda i: (i, 0)),
        compiler_params=pltpu.CompilerParams(
            dimension_semantics=("parallel",)),  # megacore sharding on v7x
    )(x2d)

    # ---- undo layout plumbing ----------------------------------------------
    return y2d.reshape(-1)[:total].reshape(orig_shape)


if __name__ == "__main__":
    key = jax.random.PRNGKey(0)
    # NCHW input, small shapes: batch=2, channels=4, spatial=16x16
    x = jax.random.normal(key, (2, 4, 16, 16), dtype=jnp.float32)

    y = dummy_module_forward(x)
    y = jax.block_until_ready(y)

    # Correctness check against the trivial reference.
    ref = x * 100.0
    assert y.shape == x.shape and y.dtype == x.dtype
    assert jnp.allclose(y, ref, rtol=1e-6, atol=1e-6)

    print("KERNEL_OK")
</pallas_src>

<mosaic_0001>
module attributes {stable_mosaic.version = 11 : i64} {
  func.func @_scale_kernel(%arg0: i32, %arg1: memref<16x128xf32, #tpu.memory_space<vmem>>, %arg2: memref<16x128xf32, #tpu.memory_space<vmem>>) attributes {dimension_semantics = [#tpu.dimension_semantics<parallel>], iteration_bounds = array<i64: 1>, scalar_prefetch = 0 : i64, scratch_operands = 0 : i64, tpu.core_type = #tpu.core_type<tc>, window_params = [{transform_indices = @transform_0, window_bounds = array<i64: 16, 128>}, {transform_indices = @transform_1, window_bounds = array<i64: 16, 128>}]} {
    %c0 = arith.constant 0 : index
    %c0_0 = arith.constant 0 : index
    %0 = vector.load %arg1[%c0, %c0_0] : memref<16x128xf32, #tpu.memory_space<vmem>>, vector<16x128xf32>
    %cst = arith.constant 1.000000e+02 : f32
    %1 = vector.broadcast %cst : f32 to vector<16x128xf32>
    %2 = arith.mulf %0, %1 : vector<16x128xf32>
    %c0_1 = arith.constant 0 : index
    %c0_2 = arith.constant 0 : index
    %3 = vector.load %arg2[%c0_1, %c0_2] : memref<16x128xf32, #tpu.memory_space<vmem>>, vector<16x128xf32>
    tpu.vector_store %arg2[%c0_1, %c0_2], %2 {strides = array<i32>} : memref<16x128xf32, #tpu.memory_space<vmem>>, vector<16x128xf32>,
    return
  }
  func.func @transform_0(%arg0: i32) -> (i32, i32) {
    %c0_i32 = arith.constant 0 : i32
    %c0_i32_0 = arith.constant 0 : i32
    return %arg0, %c0_i32 : i32, i32
  }
  func.func @transform_1(%arg0: i32) -> (i32, i32) {
    %c0_i32 = arith.constant 0 : i32
    %c0_i32_0 = arith.constant 0 : i32
    return %arg0, %c0_i32 : i32, i32
  }
}

</mosaic_0001>

<bundles_post_ra>
// kernel: tpu_custom_call.1
= control target key start
LH: loop header
LB: loop body
LE: loop exit
PB: predicated region body
PF: predicated region fallthrough
CT: control target
= control target key end

     0   :  { %6 = vsyncpa [#allocation3], 0  ;;  %s114_s0 = inlined_call_operand.hbm [shape: f32[16,128], index: 0, kind: input, shape index: {}]   ;;  %s115_s1 = inlined_call_operand.hbm [shape: f32[16,128], index: 1, kind: output, shape index: {}]  }
   0x1   :  { %7 = vsyncpa [#allocation4], 0  ;;  %s94_s6 = smov [#allocation2]  }
   0x2   :  { %s13_s7 = sshll.u32 %s94_s6, 4  ;;  %s14_s7 = int_to_ptr.vmem [resolvable:$true] %s13_s7 }
   0x3   :  { %s58_s8 = scalar_lea.vmem %s14_s7, 256  ;;  %p63_p1 = scmp.lt.s32.totalorder %s14_s7, %s14_s7 }
   0x4   :  { %p59_p0 = scmp.ne.s32.totalorder %s14_s7, %s58_s8  ;;  %p64_p2 = scmp.lt.s32.totalorder %s58_s8, %s58_s8 }
   0x6   :  { %p65_p3 = por %p64_p2, %p63_p1 }
   0x8   :  { %p66_p4 = pnand %p65_p3, %p59_p0 }
   0xa   :  { %69 = shalt.err (!%p66_p4)
}
   0xb   :  { %s95_s9 = smov 128   ;;  %s96_s10 = smov 8  }
   0xc   :  { %19 = dma.hbm_to_vmem [thread:$0]  %s114_s0, 256, %s14_s7, [#allocation3], %s95_s9, %s95_s9, %s96_s10  }
   0xd   :  { %90 = dma.done.wait [#allocation3], 256  }
   0xe   :  { %91 = vsyncadd [#allocation3], 4294967040  ;;  %s97_s13 = smov [#allocation5]   ;;  %v23_v0 = vld [vmem:[#allocation2] sm:$0xff]  ;;  %v24_v1 = vld [vmem:[#allocation2 + $0x8] sm:$0xff] }
   0xf   :  { %s34_s14 = sshll.u32 %s97_s13, 4  ;;  %v25_v2 = vmul.f32 100.0, %v23_v0  ;;  %v26_v3 = vmul.f32 100.0, %v24_v1  ;;  %s35_s14 = int_to_ptr.vmem [resolvable:$true] %s34_s14 }
  0x10   :  { %s70_s15 = scalar_lea.vmem %s35_s14, 256  ;;  %p75_p6 = scmp.lt.s32.totalorder %s35_s14, %s35_s14 }
  0x11   :  { %27 = vst [vmem:[#allocation5] sm:$0xff] %v25_v2  ;;  %28 = vst [vmem:[#allocation5 + $0x8] sm:$0xff] %v26_v3  ;;  %p71_p5 = scmp.ne.s32.totalorder %s35_s14, %s70_s15  ;;  %p76_p7 = scmp.lt.s32.totalorder %s70_s15, %s70_s15 }
  0x13   :  { %p77_p8 = por %p76_p7, %p75_p6 }
  0x15   :  { %p78_p9 = pnand %p77_p8, %p71_p5 }
  0x17   :  { %81 = shalt.err (!%p78_p9)
}
  0x18   :  { %40 = dma.vmem_to_hbm [thread:$0]  %s35_s14, 256, %s115_s1, [#allocation4], %s95_s9, %s95_s9, %s96_s10  }
  0x19   :  { %92 = dma.done.wait [#allocation4], 256  }
  0x1a   :  { %93 = vsyncadd [#allocation4], 4294967040 }
  0x1b   :  { %44 = vsyncpa [#allocation3], 1 }
  0x1c   :  { %45 = vsyncpa [#allocation4], 1 }

</bundles_post_ra>
